<compile_context>
chip_gen: v7x
topology: tpu7x:2x2x1
jax: 0.10.0
libtpu: 0.0.40
codegen_flags: <defaults>
</compile_context>

<pallas_src>
import jax
import jax.numpy as jnp
from jax.experimental import pallas as pl
from jax.experimental.pallas import tpu as pltpu


LANE = 128  # TPU lane width; batch tiling and the q relayout work in units of 128 rows.


def _round_up(x, m):
    return ((x + m - 1) // m) * m


def critic_kernel(state_ref, action_ref,
                  w1s_ref, w1a_ref, b1_ref,
                  w2_ref, b2_ref,
                  wqt_ref, bq_ref,
                  q_ref):
    # Batch streams may arrive as bf16; upcast once on the VPU, accumulate in f32.
    x_s = state_ref[...].astype(jnp.float32)
    x_a = action_ref[...].astype(jnp.float32)

    # fc1 (split-K: state part + action part, replaces torch.cat) + bias + ReLU.
    h1 = (jnp.dot(x_s, w1s_ref[...], preferred_element_type=jnp.float32)
          + jnp.dot(x_a, w1a_ref[...], preferred_element_type=jnp.float32)
          + b1_ref[...])
    h1 = jnp.maximum(h1, 0.0)

    # fc2 + bias + ReLU.
    h2 = jnp.dot(h1, w2_ref[...], preferred_element_type=jnp.float32) + b2_ref[...]
    h2 = jnp.maximum(h2, 0.0)

    # q head against the real (1, F2) weight row: broadcast multiply + lane reduce.
    q_col = jnp.sum(h2 * wqt_ref[...], axis=-1, keepdims=True) + bq_ref[...]   # (tb, 1)

    # Sublane->lane relayout (XLU is idle here): (tb, 1) -> (1, tb//128, 128),
    # making the store lane-dense and the HBM writeback contiguous (4 B / row).
    q_ref[...] = q_col.reshape(q_ref.shape)


def critic_forward(state, action, params, *,
                   block_b=2048,
                   stream_dtype=jnp.bfloat16,
                   use_pallas=None):
    """state: (B, input_dims...), action: (B, n_agents * n_actions) -> (B, 1)."""
    w1, b1, w2, b2, wq, bq = params
    B = state.shape[0]
    state_flat = state.reshape(B, -1)            # torch flatten(start_dim=1)
    S = state_flat.shape[1]
    A = action.shape[1]
    F1 = w1.shape[1]
    F2 = w2.shape[1]

    w1 = w1.astype(jnp.float32)
    b1 = b1.reshape(1, F1).astype(jnp.float32)
    w2 = w2.astype(jnp.float32)
    b2 = b2.reshape(1, F2).astype(jnp.float32)
    wq_t = wq.reshape(1, F2).astype(jnp.float32)   # (F2, 1) -> (1, F2), free
    bq = bq.reshape(1, 1).astype(jnp.float32)

    # Tiny batches: pallas_call launch/pipeline overhead dominates -> plain XLA path.
    if use_pallas is None:
        use_pallas = B >= 256
    if not use_pallas:
        x = jnp.concatenate([state_flat.astype(jnp.float32),
                             action.astype(jnp.float32)], axis=1)
        h1 = jnp.maximum(x @ w1 + b1, 0.0)
        h2 = jnp.maximum(h1 @ w2 + b2, 0.0)
        return h2 @ wq.reshape(F2, 1).astype(jnp.float32) + bq

    # Split W1 statically (replaces the in-kernel concat).
    w1s = w1[:S, :]
    w1a = w1[S:, :]

    # Batch streams in a narrow dtype (default bf16); weights / accum stay f32.
    state_s = state_flat.astype(stream_dtype)
    action_s = action.astype(stream_dtype)

    # Batch tile: multiple of 128, capped at block_b, and capped at ~ceil(B/2)
    # so the grid has >= 2 steps whenever possible (v7x megacore sharding).
    tb = min(block_b, _round_up(B, LANE))
    if B >= 2 * LANE:
        tb = min(tb, _round_up((B + 1) // 2, LANE))
    tb = max(LANE, (tb // LANE) * LANE)
    Bp = _round_up(B, tb)
    if Bp != B:
        pad = Bp - B
        state_s = jnp.pad(state_s, ((0, pad), (0, 0)))
        action_s = jnp.pad(action_s, ((0, pad), (0, 0)))
    grid = (Bp // tb,)
    rows = tb // LANE                                # q-tile rows per grid step

    def stream_spec(cols):
        return pl.BlockSpec((tb, cols), lambda i: (i, 0))

    def resident_spec(r, c):
        # Constant block index -> weight stays resident in VMEM across grid steps.
        return pl.BlockSpec((r, c), lambda i: (0, 0))

    flops = 2 * Bp * ((S + A) * F1 + F1 * F2 + F2)
    bytes_accessed = int(
        state_s.size * state_s.dtype.itemsize
        + action_s.size * action_s.dtype.itemsize
        + (w1.size + b1.size + w2.size + b2.size + wq_t.size + bq.size) * 4
        + Bp * 4)
    cost = pl.CostEstimate(flops=int(flops), transcendentals=0,
                           bytes_accessed=bytes_accessed)

    q_tiled = pl.pallas_call(
        critic_kernel,
        out_shape=jax.ShapeDtypeStruct((Bp // tb, rows, LANE), jnp.float32),
        grid=grid,
        in_specs=[
            stream_spec(S),                 # state block   (tb, S)
            stream_spec(A),                 # action block  (tb, A)
            resident_spec(S, F1),           # w1[:S]
            resident_spec(A, F1),           # w1[S:]
            resident_spec(1, F1),           # b1
            resident_spec(F1, F2),          # w2
            resident_spec(1, F2),           # b2
            resident_spec(1, F2),           # wq^T (real weights, no lane padding)
            resident_spec(1, 1),            # bq
        ],
        out_specs=pl.BlockSpec((1, rows, LANE), lambda i: (i, 0, 0)),
        compiler_params=pltpu.CompilerParams(
            dimension_semantics=("parallel",),
            vmem_limit_bytes=32 * 1024 * 1024,
        ),
        cost_estimate=cost,
    )(state_s, action_s, w1s, w1a, b1, w2, b2, wq_t, bq)

    # (grid, rows, 128) row-major == batch order -> (Bp, 1), drop padded rows.
    return q_tiled.reshape(Bp, 1)[:B]


def init_linear_params(key, in_dim, out_dim):
    """Deterministic init matching PyTorch nn.Linear default (uniform +-1/sqrt(in)).

    Weights stored pre-transposed as (in, out) so the forward computes x @ W + b.
    """
    kw, kb = jax.random.split(key)
    bound = 1.0 / jnp.sqrt(jnp.float32(in_dim))
    w = jax.random.uniform(kw, (in_dim, out_dim), jnp.float32, -bound, bound)
    b = jax.random.uniform(kb, (1, out_dim), jnp.float32, -bound, bound)
    return w, b


if __name__ == "__main__":
    # Small shapes consistent with the module's forward.
    batch = 2
    input_dims = 16
    n_agents = 3
    n_actions = 5
    fc1_dims = 64
    fc2_dims = 32

    key = jax.random.PRNGKey(0)
    k_state, k_action, k1, k2, k3 = jax.random.split(key, 5)

    state = jax.random.normal(k_state, (batch, input_dims), jnp.float32)
    action = jax.random.normal(k_action, (batch, n_agents * n_actions), jnp.float32)

    w1, b1 = init_linear_params(k1, input_dims + n_agents * n_actions, fc1_dims)
    w2, b2 = init_linear_params(k2, fc1_dims, fc2_dims)
    wq, bq = init_linear_params(k3, fc2_dims, 1)
    params = (w1, b1, w2, b2, wq, bq)

    # Reference in plain JAX (same math as the PyTorch forward), high-precision matmuls.
    hp = jax.lax.Precision.HIGHEST
    x = jnp.concatenate([state.reshape(batch, -1), action], axis=1)
    h1 = jnp.maximum(jnp.dot(x, w1, precision=hp) + b1, 0.0)
    h2 = jnp.maximum(jnp.dot(h1, w2, precision=hp) + b2, 0.0)
    q_ref = jnp.dot(h2, wq, precision=hp) + bq

    # Pallas kernel, f32 batch streams (exact-precision path).
    q_f32 = critic_forward(state, action, params,
                           stream_dtype=jnp.float32, use_pallas=True)
    jax.block_until_ready(q_f32)
    assert q_f32.shape == (batch, 1), q_f32.shape
    assert jnp.allclose(q_f32, q_ref, atol=1e-3, rtol=1e-3)

    # Pallas kernel, default bf16 batch streams (f32 weights + f32 accumulation).
    q_bf16 = critic_forward(state, action, params, use_pallas=True)
    jax.block_until_ready(q_bf16)
    assert q_bf16.shape == (batch, 1), q_bf16.shape
    assert jnp.allclose(q_bf16, q_ref, atol=5e-2, rtol=5e-2)

    print("KERNEL_OK")
</pallas_src>

<mosaic_0001>
module attributes {stable_mosaic.version = 11 : i64} {
  func.func @critic_kernel(%arg0: i32, %arg1: memref<128x16xf32, #tpu.memory_space<vmem>>, %arg2: memref<128x15xf32, #tpu.memory_space<vmem>>, %arg3: memref<16x64xf32, #tpu.memory_space<vmem>>, %arg4: memref<15x64xf32, #tpu.memory_space<vmem>>, %arg5: memref<1x64xf32, #tpu.memory_space<vmem>>, %arg6: memref<64x32xf32, #tpu.memory_space<vmem>>, %arg7: memref<1x32xf32, #tpu.memory_space<vmem>>, %arg8: memref<1x32xf32, #tpu.memory_space<vmem>>, %arg9: memref<1x1xf32, #tpu.memory_space<vmem>>, %arg10: memref<1x1x128xf32, #tpu.memory_space<vmem>>) attributes {dimension_semantics = [#tpu.dimension_semantics<parallel>], iteration_bounds = array<i64: 1>, scalar_prefetch = 0 : i64, scratch_operands = 0 : i64, tpu.core_type = #tpu.core_type<tc>, window_params = [{transform_indices = @transform_0, window_bounds = array<i64: 128, 16>}, {transform_indices = @transform_1, window_bounds = array<i64: 128, 15>}, {pipeline_mode = #tpu.pipeline_mode<synchronous>, transform_indices = @transform_2, window_bounds = array<i64: 16, 64>}, {pipeline_mode = #tpu.pipeline_mode<synchronous>, transform_indices = @transform_3, window_bounds = array<i64: 15, 64>}, {pipeline_mode = #tpu.pipeline_mode<synchronous>, transform_indices = @transform_4, window_bounds = array<i64: 1, 64>}, {pipeline_mode = #tpu.pipeline_mode<synchronous>, transform_indices = @transform_5, window_bounds = array<i64: 64, 32>}, {pipeline_mode = #tpu.pipeline_mode<synchronous>, transform_indices = @transform_6, window_bounds = array<i64: 1, 32>}, {pipeline_mode = #tpu.pipeline_mode<synchronous>, transform_indices = @transform_7, window_bounds = array<i64: 1, 32>}, {pipeline_mode = #tpu.pipeline_mode<synchronous>, transform_indices = @transform_8, window_bounds = array<i64: 1, 1>}, {transform_indices = @transform_9, window_bounds = array<i64: 1, 1, 128>}]} {
    %c0 = arith.constant 0 : index
    %c0_0 = arith.constant 0 : index
    %0 = vector.load %arg1[%c0, %c0_0] : memref<128x16xf32, #tpu.memory_space<vmem>>, vector<128x16xf32>
    %c0_1 = arith.constant 0 : index
    %c0_2 = arith.constant 0 : index
    %1 = vector.load %arg2[%c0_1, %c0_2] : memref<128x15xf32, #tpu.memory_space<vmem>>, vector<128x15xf32>
    %c0_3 = arith.constant 0 : index
    %c0_4 = arith.constant 0 : index
    %2 = vector.load %arg3[%c0_3, %c0_4] : memref<16x64xf32, #tpu.memory_space<vmem>>, vector<16x64xf32>
    %cst = arith.constant dense<0.000000e+00> : vector<128x64xf32>
    %3 = tpu.matmul %0, %2, %cst {dimension_numbers = #tpu.dot_dimension_numbers<[1], [0], [0], [1], [0, 0, 1, 1], [], []>} : vector<128x16xf32>, vector<16x64xf32>, vector<128x64xf32> -> vector<128x64xf32>
    %c0_5 = arith.constant 0 : index
    %c0_6 = arith.constant 0 : index
    %4 = vector.load %arg4[%c0_5, %c0_6] : memref<15x64xf32, #tpu.memory_space<vmem>>, vector<15x64xf32>
    %cst_7 = arith.constant dense<0.000000e+00> : vector<128x64xf32>
    %5 = tpu.matmul %1, %4, %cst_7 {dimension_numbers = #tpu.dot_dimension_numbers<[1], [0], [0], [1], [0, 0, 1, 1], [], []>} : vector<128x15xf32>, vector<15x64xf32>, vector<128x64xf32> -> vector<128x64xf32>
    %6 = arith.addf %3, %5 : vector<128x64xf32>
    %c0_8 = arith.constant 0 : index
    %c0_9 = arith.constant 0 : index
    %7 = vector.load %arg5[%c0_8, %c0_9] : memref<1x64xf32, #tpu.memory_space<vmem>>, vector<1x64xf32>
    %8 = vector.broadcast %7 : vector<1x64xf32> to vector<128x64xf32>
    %9 = arith.addf %6, %8 : vector<128x64xf32>
    %cst_10 = arith.constant 0.000000e+00 : f32
    %10 = vector.broadcast %cst_10 : f32 to vector<128x64xf32>
    %11 = arith.maximumf %9, %10 : vector<128x64xf32>
    %c0_11 = arith.constant 0 : index
    %c0_12 = arith.constant 0 : index
    %12 = vector.load %arg6[%c0_11, %c0_12] : memref<64x32xf32, #tpu.memory_space<vmem>>, vector<64x32xf32>
    %cst_13 = arith.constant dense<0.000000e+00> : vector<128x32xf32>
    %13 = tpu.matmul %11, %12, %cst_13 {dimension_numbers = #tpu.dot_dimension_numbers<[1], [0], [0], [1], [0, 0, 1, 1], [], []>} : vector<128x64xf32>, vector<64x32xf32>, vector<128x32xf32> -> vector<128x32xf32>
    %c0_14 = arith.constant 0 : index
    %c0_15 = arith.constant 0 : index
    %14 = vector.load %arg7[%c0_14, %c0_15] : memref<1x32xf32, #tpu.memory_space<vmem>>, vector<1x32xf32>
    %15 = vector.broadcast %14 : vector<1x32xf32> to vector<128x32xf32>
    %16 = arith.addf %13, %15 : vector<128x32xf32>
    %cst_16 = arith.constant 0.000000e+00 : f32
    %17 = vector.broadcast %cst_16 : f32 to vector<128x32xf32>
    %18 = arith.maximumf %16, %17 : vector<128x32xf32>
    %c0_17 = arith.constant 0 : index
    %c0_18 = arith.constant 0 : index
    %19 = vector.load %arg8[%c0_17, %c0_18] : memref<1x32xf32, #tpu.memory_space<vmem>>, vector<1x32xf32>
    %20 = vector.broadcast %19 : vector<1x32xf32> to vector<128x32xf32>
    %21 = arith.mulf %18, %20 : vector<128x32xf32>
    %cst_19 = arith.constant dense<0.000000e+00> : vector<128xf32>
    %22 = vector.multi_reduction <add>, %21, %cst_19 [1] : vector<128x32xf32> to vector<128xf32>
    %23 = vector.shape_cast %22 : vector<128xf32> to vector<128x1xf32>
    %c0_20 = arith.constant 0 : index
    %c0_21 = arith.constant 0 : index
    %24 = vector.load %arg9[%c0_20, %c0_21] : memref<1x1xf32, #tpu.memory_space<vmem>>, vector<1x1xf32>
    %25 = vector.broadcast %24 : vector<1x1xf32> to vector<128x1xf32>
    %26 = arith.addf %23, %25 : vector<128x1xf32>
    %27 = vector.shape_cast %26 : vector<128x1xf32> to vector<1x1x128xf32>
    %c0_22 = arith.constant 0 : index
    %c0_23 = arith.constant 0 : index
    %c0_24 = arith.constant 0 : index
    %28 = vector.load %arg10[%c0_22, %c0_23, %c0_24] : memref<1x1x128xf32, #tpu.memory_space<vmem>>, vector<1x1x128xf32>
    tpu.vector_store %arg10[%c0_22, %c0_23, %c0_24], %27 {strides = array<i32>} : memref<1x1x128xf32, #tpu.memory_space<vmem>>, vector<1x1x128xf32>,
    return
  }
  func.func @transform_0(%arg0: i32) -> (i32, i32) {
    %c0_i32 = arith.constant 0 : i32
    %c0_i32_0 = arith.constant 0 : i32
    return %arg0, %c0_i32 : i32, i32
  }
  func.func @transform_1(%arg0: i32) -> (i32, i32) {
    %c0_i32 = arith.constant 0 : i32
    %c0_i32_0 = arith.constant 0 : i32
    return %arg0, %c0_i32 : i32, i32
  }
  func.func @transform_2(%arg0: i32) -> (i32, i32) {
    %c0_i32 = arith.constant 0 : i32
    %c0_i32_0 = arith.constant 0 : i32
    %c0_i32_1 = arith.constant 0 : i32
    return %c0_i32, %c0_i32_0 : i32, i32
  }
  func.func @transform_3(%arg0: i32) -> (i32, i32) {
    %c0_i32 = arith.constant 0 : i32
    %c0_i32_0 = arith.constant 0 : i32
    %c0_i32_1 = arith.constant 0 : i32
    return %c0_i32, %c0_i32_0 : i32, i32
  }
  func.func @transform_4(%arg0: i32) -> (i32, i32) {
    %c0_i32 = arith.constant 0 : i32
    %c0_i32_0 = arith.constant 0 : i32
    %c0_i32_1 = arith.constant 0 : i32
    return %c0_i32, %c0_i32_0 : i32, i32
  }
  func.func @transform_5(%arg0: i32) -> (i32, i32) {
    %c0_i32 = arith.constant 0 : i32
    %c0_i32_0 = arith.constant 0 : i32
    %c0_i32_1 = arith.constant 0 : i32
    return %c0_i32, %c0_i32_0 : i32, i32
  }
  func.func @transform_6(%arg0: i32) -> (i32, i32) {
    %c0_i32 = arith.constant 0 : i32
    %c0_i32_0 = arith.constant 0 : i32
    %c0_i32_1 = arith.constant 0 : i32
    return %c0_i32, %c0_i32_0 : i32, i32
  }
  func.func @transform_7(%arg0: i32) -> (i32, i32) {
    %c0_i32 = arith.constant 0 : i32
    %c0_i32_0 = arith.constant 0 : i32
    %c0_i32_1 = arith.constant 0 : i32
    return %c0_i32, %c0_i32_0 : i32, i32
  }
  func.func @transform_8(%arg0: i32) -> (i32, i32) {
    %c0_i32 = arith.constant 0 : i32
    %c0_i32_0 = arith.constant 0 : i32
    %c0_i32_1 = arith.constant 0 : i32
    return %c0_i32, %c0_i32_0 : i32, i32
  }
  func.func @transform_9(%arg0: i32) -> (i32, i32, i32) {
    %c0_i32 = arith.constant 0 : i32
    %c0_i32_0 = arith.constant 0 : i32
    %c0_i32_1 = arith.constant 0 : i32
    return %arg0, %c0_i32, %c0_i32_0 : i32, i32, i32
  }
}

</mosaic_0001>

<bundles_post_ra>
// kernel: tpu_custom_call.1
= control target key start
LH: loop header
LB: loop body
LE: loop exit
PB: predicated region body
PF: predicated region fallthrough
CT: control target
= control target key end

     0   :  { %s1661_s0 = inlined_call_operand.vmem [shape: f32[128,16], index: 0, kind: input, shape index: {}]   ;;  %s1662_s1 = inlined_call_operand.vmem [shape: f32[128,15], index: 1, kind: input, shape index: {}]   ;;  %s1663_s2 = inlined_call_operand.vmem [shape: f32[16,64], index: 2, kind: input, shape index: {}]   ;;  %s1664_s3 = inlined_call_operand.vmem [shape: f32[15,64], index: 3, kind: input, shape index: {}]   ;;  %s1665_s4 = inlined_call_operand.vmem [shape: f32[1,64], index: 4, kind: input, shape index: {}]   ;;  %s1666_s5 = inlined_call_operand.vmem [shape: f32[64,32], index: 5, kind: input, shape index: {}]   ;;  %s1667_s6 = inlined_call_operand.vmem [shape: f32[1,32], index: 6, kind: input, shape index: {}]   ;;  %s1668_s7 = inlined_call_operand.vmem [shape: f32[1,32], index: 7, kind: input, shape index: {}]   ;;  %s1669_s8 = inlined_call_operand.<no memory space> [shape: f32[1,1], index: 8, kind: input, shape index: {}]   ;;  %s1670_s9 = inlined_call_operand.hbm [shape: f32[1,1,128], index: 9, kind: output, shape index: {}]  }
   0x1   :  { %v14_v0 = vstv %s1669_s8 }
   0x2   :  { %15 = vst [vmem:[#allocation2] sm:$0x1] %v14_v0 }
   0x3   :  { %v69_v1 = vld [vmem:[%s1664_s3] sm:$0xff]  ;;  %v70_v2 = vld [vmem:[%s1664_s3 + $0x8] sm:$0x7f]  ;;  %vm120_vm0 = vcmask 1046528   ;;  %vm1295_vm1 = vmmov 1   ;;  %vm71_vm3 = vcmask 121856  }
   0x4   :  { %v51_v3 = vld [vmem:[%s1662_s1] sm:$0xff]  ;;  %v1222_v4 = vpack.c.bf16 %v70_v2, %v69_v1  ;;  %vm1223_vm2 = vmpackc.low %vm120_vm0, %vm1295_vm1  ;;  %v68_v6 = vld [vmem:[%s1663_s2 + $0x8] sm:$0xff] }
   0x5   :  { %v67_v5 = vld [vmem:[%s1663_s2] sm:$0xff]  ;;  %1130 = vmatprep.mubr.msk.f32.mxu0 %vm71_vm3, %v51_v3  ;;  %v52_v8 = vld [vmem:[%s1662_s1 + $0x8] sm:$0xff]  ;;  %v53_v9 = vld [vmem:[%s1662_s1 + $0x10] sm:$0xff] }
   0x6   :  { %1224 = vmatprep.subr.msk.bf16.mxu0 %vm1223_vm2, %v1222_v4  ;;  %v1228_v7 = vpack.c.bf16 %v68_v6, %v67_v5  ;;  %1248 = vmatprep.subr.msk.bf16.mxu1 %vm1223_vm2, %v1222_v4  ;;  %v59_v10 = vld [vmem:[%s1662_s1 + $0x40] sm:$0xff]  ;;  %v60_v11 = vld [vmem:[%s1662_s1 + $0x48] sm:$0xff]  ;;  %v54_v12 = vld [vmem:[%s1662_s1 + $0x18] sm:$0xff] }
   0x7   :  { %1227 = vmatpush3.bf16.msk.msra.mxu0 %vm1223_vm2, %v1222_v4  ;;  %1249 = vmatpush3.bf16.msk.msra.mxu1 %vm1223_vm2, %v1222_v4  ;;  %v61_v13 = vld [vmem:[%s1662_s1 + $0x50] sm:$0xff]  ;;  %v55_v14 = vld [vmem:[%s1662_s1 + $0x20] sm:$0xff]  ;;  %v56_v15 = vld [vmem:[%s1662_s1 + $0x28] sm:$0xff] }
   0x8   :  { %1229 = vmatprep.subr.bf16.mxu0 %v1228_v7  ;;  %1142 = vmatprep.mubr.msk.f32.mxu1 %vm71_vm3, %v59_v10  ;;  %v62_v16 = vld [vmem:[%s1662_s1 + $0x58] sm:$0xff]  ;;  %v63_v17 = vld [vmem:[%s1662_s1 + $0x60] sm:$0xff]  ;;  %v503_v19 = vld [vmem:[%s1666_s5 + $0x8] sm:$0xff] }
   0x9   :  { %v502_v18 = vld [vmem:[%s1666_s5] sm:$0xff]  ;;  %v57_v20 = vld [vmem:[%s1662_s1 + $0x30] sm:$0xff]  ;;  %v505_v23 = vld [vmem:[%s1666_s5 + $0x18] sm:$0xff] }
   0xa   :  { %1131 = vmatmul.mubr.msk.f32.vlgmr.msra.gmra.mrb[0].mxu0 %vm71_vm3, %v52_v8  ;;  %1143 = vmatmul.mubr.msk.f32.vlgmr.msra.gmra.mrb[0].mxu1 %vm71_vm3, %v60_v11  ;;  %v1232_v21 = vpack.c.bf16 %v503_v19, %v502_v18  ;;  %v504_v22 = vld [vmem:[%s1666_s5 + $0x10] sm:$0xff] }
   0xb   :  { %1231 = vmatpush3.bf16.msra.mxu0 %v1228_v7  ;;  %1133 = vmatprep.mubr.msk.f32.mxu0 %vm71_vm3, %v53_v9  ;;  %v1236_v24 = vpack.c.bf16 %v505_v23, %v504_v22 }
   0xc   :  { %1145 = vmatprep.mubr.msk.f32.mxu1 %vm71_vm3, %v61_v13 }
   0xe   :  { %1134 = vmatmul.mubr.msk.f32.gmra.mrb[2].mxu0 %vm71_vm3, %v54_v12  ;;  %1146 = vmatmul.mubr.msk.f32.gmra.mrb[2].mxu1 %vm71_vm3, %v62_v16 }
   0xf   :  { %1136 = vmatprep.mubr.msk.f32.mxu0 %vm71_vm3, %v55_v14 }
  0x10   :  { %16 = vsyncpa [#allocation4], 0  ;;  %1148 = vmatprep.mubr.msk.f32.mxu1 %vm71_vm3, %v63_v17  ;;  %v64_v25 = vld [vmem:[%s1662_s1 + $0x68] sm:$0xff]  ;;  %v506_v26 = vld [vmem:[%s1666_s5 + $0x20] sm:$0xff]  ;;  %1233 = vmatprep.subr.bf16.mxu1 %v1232_v21  ;;  %vm269_vm4 = vcmask 130048   ;;  %vm517_vm5 = vcmask 523264  }
  0x11   :  { %v507_v27 = vld [vmem:[%s1666_s5 + $0x28] sm:$0xff]  ;;  %v58_v28 = vld [vmem:[%s1662_s1 + $0x38] sm:$0xff]  ;;  %v65_v29 = vld [vmem:[%s1662_s1 + $0x70] sm:$0xff]  ;;  %1235 = vmatpush3.bf16.msra.mxu1 %v1232_v21  ;;  %vm750_vm6 = vcmask 261120   ;;  %vm897_vm7 = vcmask 130112   ;;  %vm904_vm8 = vcmask 195712  }
  0x12   :  { %1137 = vmatmul.mubr.msk.f32.gmra.mrb[4].mxu0 %vm71_vm3, %v56_v15  ;;  %v35_v30 = vld [vmem:[%s1661_s0] sm:$0xff]  ;;  %1149 = vmatmul.mubr.msk.f32.gmra.mrb[4].mxu1 %vm71_vm3, %v64_v25  ;;  %v1240_v31 = vpack.c.bf16 %v507_v27, %v506_v26  ;;  %v66_v32 = vld [vmem:[%s1662_s1 + $0x78] sm:$0xff]  ;;  %v36_v33 = vld [vmem:[%s1661_s0 + $0x8] sm:$0xff]  ;;  %vm911_vm9 = vcmask 261312   ;;  %vm918_vm10 = vcmask 326912   ;;  %vm925_vm11 = vcmask 392512  }
  0x13   :  { %1139 = vmatprep.mubr.msk.f32.mxu0 %vm71_vm3, %v57_v20  ;;  %1237 = vmatprep.subr.bf16.mxu1 %v1236_v24  ;;  %v37_v34 = vld [vmem:[%s1661_s0 + $0x10] sm:$0xff]  ;;  %v38_v35 = vld [vmem:[%s1661_s0 + $0x18] sm:$0xff]  ;;  %v39_v36 = vld [vmem:[%s1661_s0 + $0x20] sm:$0xff]  ;;  %vm932_vm12 = vcmask 458112   ;;  %vm939_vm13 = vcmask 523712   ;;  %vm946_vm14 = vcmask 589312  }
  0x14   :  { %1151 = vmatprep.mubr.msk.f32.mxu1 %vm71_vm3, %v65_v29  ;;  %v40_v37 = vld [vmem:[%s1661_s0 + $0x28] sm:$0xff]  ;;  %v41_v38 = vld [vmem:[%s1661_s0 + $0x30] sm:$0xff]  ;;  %v42_v39 = vld [vmem:[%s1661_s0 + $0x38] sm:$0xff]  ;;  %vm953_vm15 = vcmask 654912   ;;  %vm960_vm0 = vcmask 720512   ;;  %vm967_vm1 = vcmask 786112  }
  0x15   :  { %1239 = vmatpush3.bf16.msra.mxu1 %v1236_v24  ;;  %v43_v40 = vld [vmem:[%s1661_s0 + $0x40] sm:$0xff]  ;;  %v44_v41 = vld [vmem:[%s1661_s0 + $0x48] sm:$0xff]  ;;  %v45_v42 = vld [vmem:[%s1661_s0 + $0x50] sm:$0xff]  ;;  %vm974_vm2 = vcmask 851712  }
  0x16   :  { %1140 = vmatmul.mubr.msk.f32.gmra.mrb[6].mxu0 %vm71_vm3, %v58_v28  ;;  %1152 = vmatmul.mubr.msk.f32.gmra.mrb[6].mxu1 %vm71_vm3, %v66_v32  ;;  %v46_v43 = vld [vmem:[%s1661_s0 + $0x58] sm:$0xff]  ;;  %v47_v44 = vld [vmem:[%s1661_s0 + $0x60] sm:$0xff]  ;;  %v48_v45 = vld [vmem:[%s1661_s0 + $0x68] sm:$0xff]  ;;  %vm981_vm3 = vcmask 917312  }
  0x17   :  { %1158 = vmatprep.mubr.msk.f32.mxu0 %vm269_vm4, %v35_v30  ;;  %1241 = vmatprep.subr.bf16.mxu1 %v1240_v31  ;;  %v49_v46 = vld [vmem:[%s1661_s0 + $0x70] sm:$0xff]  ;;  %v50_v47 = vld [vmem:[%s1661_s0 + $0x78] sm:$0xff]  ;;  %v1518_v57 = vld [vmem:[%s1665_s4] ss:$0 sm:$0xff] }
  0x18   :  { %v508_v48 = vld [vmem:[%s1666_s5 + $0x30] sm:$0xff]  ;;  %v509_v49 = vld [vmem:[%s1666_s5 + $0x38] sm:$0xff] }
  0x19   :  { %1243 = vmatpush3.bf16.msra.mxu1 %v1240_v31  ;;  %v1244_v50 = vpack.c.bf16 %v509_v49, %v508_v48 }
  0x1a   :  { %1159 = vmatmul.mubr.msk.f32.vlgmr.msra.gmra.mrb[0].mxu0 %vm269_vm4, %v36_v33 }
  0x1b   :  { %1161 = vmatprep.mubr.msk.f32.mxu0 %vm269_vm4, %v37_v34  ;;  %1245 = vmatprep.subr.bf16.mxu1 %v1244_v50 }
  0x1d   :  { %1247 = vmatpush3.bf16.msra.mxu1 %v1244_v50 }
  0x1e   :  { %1162 = vmatmul.mubr.msk.f32.gmra.mrb[2].mxu0 %vm269_vm4, %v38_v35 }
  0x1f   :  { %1164 = vmatprep.mubr.msk.f32.mxu0 %vm269_vm4, %v39_v36 }
  0x22   :  { %1165 = vmatmul.mubr.msk.f32.gmra.mrb[4].mxu0 %vm269_vm4, %v40_v37 }
  0x23   :  { %1167 = vmatprep.mubr.msk.f32.mxu0 %vm269_vm4, %v41_v38 }
  0x26   :  { %1168 = vmatmul.mubr.msk.f32.gmra.mrb[6].mxu0 %vm269_vm4, %v42_v39 }
  0x27   :  { %1170 = vmatprep.mubr.msk.f32.mxu0 %vm269_vm4, %v43_v40 }
  0x2a   :  { %1171 = vmatmul.mubr.msk.f32.gmra.mrb[8].mxu0 %vm269_vm4, %v44_v41 }
  0x2b   :  { %1173 = vmatprep.mubr.msk.f32.mxu0 %vm269_vm4, %v45_v42 }
  0x2e   :  { %1174 = vmatmul.mubr.msk.f32.gmra.mrb[10].mxu0 %vm269_vm4, %v46_v43 }
  0x2f   :  { %1176 = vmatprep.mubr.msk.f32.mxu0 %vm269_vm4, %v47_v44 }
  0x32   :  { %1177 = vmatmul.mubr.msk.f32.gmra.mrb[12].mxu0 %vm269_vm4, %v48_v45 }
  0x33   :  { %1179 = vmatprep.mubr.msk.f32.mxu0 %vm269_vm4, %v49_v46 }
  0x36   :  { %1180 = vmatmul.mubr.msk.f32.gmra.mrb[14].mxu0 %vm269_vm4, %v50_v47  ;;  %vm988_vm4 = vcmask 982912  }
  0xdd   :  { %v1144_v51 = vpop.f32.mrb[0].mxu1 }
  0xde   :  { %v230_v52 = vpop.f32.mrb[1].mxu1 }
  0xe1   :  { %v1147_v53 = vpop.f32.mrb[2].mxu1 }
  0xe2   :  { %v240_v54 = vpop.f32.mrb[3].mxu1 }
  0xe5   :  { %v1150_v55 = vpop.f32.mrb[4].mxu1 }
  0xe6   :  { %v250_v56 = vpop.f32.mrb[5].mxu1 }
  0xe9   :  { %v1153_v58 = vpop.f32.mrb[6].mxu1 }
  0xea   :  { %v1520_v60 = vpop.f32.mrb[7].mxu1 }
  0xed   :  { %v1160_v59 = vpop.f32.mrb[0].mxu0 }
  0xee   :  { %v471_v61 = vadd.f32 %v1160_v59, %v1518_v57  ;;  %v384_v62 = vpop.f32.mrb[1].mxu0 }
  0xef   :  { %v470_v63 = vadd.f32 %v1518_v57, %v384_v62 }
  0xf0   :  { %v487_v2 = vmax.f32 %v471_v61, 0.0 }
  0xf1   :  { %v486_v0 = vmax.f32 %v470_v63, 0.0  ;;  %v1163_v1 = vpop.f32.mrb[2].mxu0 }
  0xf2   :  { %v473_v3 = vadd.f32 %v1163_v1, %v1518_v57  ;;  %v394_v4 = vpop.f32.mrb[3].mxu0 }
  0xf3   :  { %v472_v5 = vadd.f32 %v1518_v57, %v394_v4  ;;  %1198 = vmatprep.mubr.msk.f32.mxu1 %vm517_vm5, %v486_v0 }
  0xf4   :  { %1199 = vmatmul.mubr.msk.f32.vlgmr.msra.gmra.mrb[8].mxu1 %vm517_vm5, %v487_v2  ;;  %v489_v8 = vmax.f32 %v473_v3, 0.0 }
  0xf5   :  { %v488_v6 = vmax.f32 %v472_v5, 0.0  ;;  %v1166_v7 = vpop.f32.mrb[4].mxu0 }
  0xf6   :  { %v475_v9 = vadd.f32 %v1166_v7, %v1518_v57  ;;  %v404_v10 = vpop.f32.mrb[5].mxu0 }
  0xf7   :  { %v474_v11 = vadd.f32 %v1518_v57, %v404_v10  ;;  %1201 = vmatprep.mubr.msk.f32.mxu1 %vm517_vm5, %v488_v6 }
  0xf8   :  { %1202 = vmatmul.mubr.msk.f32.gmra.mrb[10].mxu1 %vm517_vm5, %v489_v8  ;;  %v491_v14 = vmax.f32 %v475_v9, 0.0 }
  0xf9   :  { %v490_v12 = vmax.f32 %v474_v11, 0.0  ;;  %v1169_v13 = vpop.f32.mrb[6].mxu0 }
  0xfa   :  { %v477_v15 = vadd.f32 %v1169_v13, %v1518_v57  ;;  %v414_v16 = vpop.f32.mrb[7].mxu0 }
  0xfb   :  { %v476_v17 = vadd.f32 %v1518_v57, %v414_v16  ;;  %1204 = vmatprep.mubr.msk.f32.mxu1 %vm517_vm5, %v490_v12 }
  0xfc   :  { %1205 = vmatmul.mubr.msk.f32.gmra.mrb[12].mxu1 %vm517_vm5, %v491_v14  ;;  %v493_v20 = vmax.f32 %v477_v15, 0.0 }
  0xfd   :  { %v492_v18 = vmax.f32 %v476_v17, 0.0  ;;  %v1172_v19 = vpop.f32.mrb[8].mxu0 }
  0xfe   :  { %v430_v21 = vadd.f32 %v1172_v19, %v1144_v51  ;;  %v424_v22 = vpop.f32.mrb[9].mxu0 }
  0xff   :  { %1207 = vmatprep.mubr.msk.f32.mxu1 %vm517_vm5, %v492_v18  ;;  %v425_v23 = vadd.f32 %v424_v22, %v230_v52  ;;  %v1558_v52 = vld [vmem:[%s1667_s6] ss:$0 sm:$0xff]  ;;  %s1297_s6 = smov [#allocation3]  }
 0x100   :  { %v479_v24 = vadd.f32 %v1518_v57, %v430_v21  ;;  %1208 = vmatmul.mubr.msk.f32.gmra.mrb[14].mxu1 %vm517_vm5, %v493_v20 }
 0x101   :  { %v478_v25 = vadd.f32 %v1518_v57, %v425_v23  ;;  %v1175_v26 = vpop.f32.mrb[10].mxu0 }
 0x102   :  { %v495_v27 = vmax.f32 %v479_v24, 0.0  ;;  %v440_v28 = vadd.f32 %v1175_v26, %v1147_v53  ;;  %v434_v29 = vpop.f32.mrb[11].mxu0 }
 0x103   :  { %v494_v30 = vmax.f32 %v478_v25, 0.0  ;;  %v435_v31 = vadd.f32 %v434_v29, %v240_v54 }
 0x104   :  { %v481_v32 = vadd.f32 %v1518_v57, %v440_v28 }
 0x105   :  { %v480_v33 = vadd.f32 %v1518_v57, %v435_v31  ;;  %v1178_v34 = vpop.f32.mrb[12].mxu0  ;;  %1210 = vmatprep.mubr.msk.f32.mxu1 %vm517_vm5, %v494_v30 }
 0x106   :  { %v497_v35 = vmax.f32 %v481_v32, 0.0  ;;  %v450_v36 = vadd.f32 %v1178_v34, %v1150_v55  ;;  %v444_v37 = vpop.f32.mrb[13].mxu0  ;;  %1211 = vmatmul.mubr.msk.f32.gmra.mrb[16].mxu1 %vm517_vm5, %v495_v27 }
 0x107   :  { %v496_v38 = vmax.f32 %v480_v33, 0.0  ;;  %v445_v39 = vadd.f32 %v444_v37, %v250_v56 }
 0x108   :  { %v483_v40 = vadd.f32 %v1518_v57, %v450_v36 }
 0x109   :  { %v482_v41 = vadd.f32 %v1518_v57, %v445_v39  ;;  %v1181_v42 = vpop.f32.mrb[14].mxu0  ;;  %1213 = vmatprep.mubr.msk.f32.mxu1 %vm517_vm5, %v496_v38 }
 0x10a   :  { %v499_v43 = vmax.f32 %v483_v40, 0.0  ;;  %v460_v44 = vadd.f32 %v1181_v42, %v1153_v58  ;;  %v454_v45 = vpop.f32.mrb[15].mxu0  ;;  %1214 = vmatmul.mubr.msk.f32.gmra.mrb[18].mxu1 %vm517_vm5, %v497_v35  ;;  %v1296_v40 = vmov 0  }
 0x10b   :  { %v498_v46 = vmax.f32 %v482_v41, 0.0  ;;  %v455_v47 = vadd.f32 %v454_v45, %v1520_v60  ;;  %1269 = vset.pattern.permute.xlu1 %v1296_v40  ;;  %1270 = vset.pattern.permute.xlu0 %v1296_v40  ;;  %v886_v40 = vlaneseq }
 0x10c   :  { %v485_v48 = vadd.f32 %v1518_v57, %v460_v44 }
 0x10d   :  { %v484_v49 = vadd.f32 %v1518_v57, %v455_v47  ;;  %1216 = vmatprep.mubr.msk.f32.mxu1 %vm517_vm5, %v498_v46  ;;  %v1565_v57 = vld [vmem:[%s1668_s7] ss:$0 sm:$0xff]  ;;  %s1005_s7 = sshll.u32 %s1297_s6, 4  ;;  %s1006_s7 = int_to_ptr.vmem [resolvable:$true] %s1005_s7 }
 0x10e   :  { %v501_v50 = vmax.f32 %v485_v48, 0.0  ;;  %1217 = vmatmul.mubr.msk.f32.gmra.mrb[20].mxu1 %vm517_vm5, %v499_v43  ;;  %s1271_s25 = scalar_lea.vmem %s1006_s7, 16  ;;  %s1275_s26 = scalar_lea.vmem %s1006_s7, 32 }
 0x10f   :  { %v500_v51 = vmax.f32 %v484_v49, 0.0  ;;  %p1272_p0 = scmp.ne.s32.totalorder %s1006_s7, %s1271_s25  ;;  %p1276_p1 = scmp.lt.s32.totalorder %s1006_s7, %s1006_s7 }
 0x110   :  { %p1277_p2 = scmp.lt.s32.totalorder %s1275_s26, %s1271_s25 }
 0x111   :  { %1219 = vmatprep.mubr.msk.f32.mxu1 %vm517_vm5, %v500_v51 }
 0x112   :  { %1220 = vmatmul.mubr.msk.f32.gmra.mrb[22].mxu1 %vm517_vm5, %v501_v50  ;;  %vm995_vm5 = vcmask 1048512   ;;  %p1278_p3 = por %p1277_p2, %p1276_p1 }
 0x114   :  { %p1279_p4 = pnand %p1278_p3, %p1272_p0 }
 0x1c7   :  { %v1200_v53 = vpop.f32.mrb[8].mxu1 }
 0x1c8   :  { %v638_v54 = vadd.f32 %v1200_v53, %v1558_v52  ;;  %v632_v55 = vpop.f32.mrb[9].mxu1 }
 0x1c9   :  { %v633_v56 = vadd.f32 %v1558_v52, %v632_v55 }
 0x1ca   :  { %v712_v58 = vmax.f32 %v638_v54, 0.0 }
 0x1cb   :  { %v711_v59 = vmax.f32 %v633_v56, 0.0  ;;  %v1203_v60 = vpop.f32.mrb[10].mxu1 }
 0x1cc   :  { %v648_v61 = vadd.f32 %v1203_v60, %v1558_v52  ;;  %v642_v62 = vpop.f32.mrb[11].mxu1  ;;  %v735_v63 = vmul.f32 %v1565_v57, %v712_v58 }
 0x1cd   :  { %v643_v0 = vadd.f32 %v1558_v52, %v642_v62  ;;  %v734_v3 = vmul.f32 %v1565_v57, %v711_v59 }
 0x1ce   :  { %v714_v1 = vmax.f32 %v648_v61, 0.0  ;;  %v754_v2 = vsel %vm750_vm6, %v735_v63, 0.0 }
 0x1cf   :  { %v713_v4 = vmax.f32 %v643_v0, 0.0  ;;  %755 = vadd.xlane.f32.xlu0 %v754_v2  ;;  %v1206_v5 = vpop.f32.mrb[12].mxu1  ;;  %v751_v11 = vsel %vm750_vm6, %v734_v3, 0.0 }
 0x1d0   :  { %v658_v6 = vadd.f32 %v1206_v5, %v1558_v52  ;;  %v652_v7 = vpop.f32.mrb[13].mxu1  ;;  %v737_v8 = vmul.f32 %v1565_v57, %v714_v1 }
 0x1d1   :  { %v653_v9 = vadd.f32 %v1558_v52, %v652_v7  ;;  %v736_v13 = vmul.f32 %v1565_v57, %v713_v4 }
 0x1d2   :  { %v716_v10 = vmax.f32 %v658_v6, 0.0  ;;  %v760_v12 = vsel %vm750_vm6, %v737_v8, 0.0 }
 0x1d3   :  { %v715_v14 = vmax.f32 %v653_v9, 0.0  ;;  %752 = vadd.xlane.f32.xlu0 %v751_v11  ;;  %761 = vadd.xlane.f32.xlu1 %v760_v12  ;;  %v1209_v15 = vpop.f32.mrb[14].mxu1  ;;  %v757_v21 = vsel %vm750_vm6, %v736_v13, 0.0 }
 0x1d4   :  { %v668_v16 = vadd.f32 %v1209_v15, %v1558_v52  ;;  %v662_v17 = vpop.f32.mrb[15].mxu1  ;;  %v739_v22 = vmul.f32 %v1565_v57, %v716_v10 }
 0x1d5   :  { %v663_v18 = vadd.f32 %v1558_v52, %v662_v17  ;;  %v738_v19 = vmul.f32 %v1565_v57, %v715_v14 }
 0x1d6   :  { %v718_v20 = vmax.f32 %v668_v16, 0.0  ;;  %v766_v27 = vsel %vm750_vm6, %v739_v22, 0.0 }
 0x1d7   :  { %v717_v23 = vmax.f32 %v663_v18, 0.0  ;;  %758 = vadd.xlane.f32.xlu1 %v757_v21  ;;  %v763_v24 = vsel %vm750_vm6, %v738_v19, 0.0 }
 0x1d8   :  { %764 = vadd.xlane.f32.xlu0 %v763_v24  ;;  %v741_v30 = vmul.f32 %v1565_v57, %v718_v20 }
 0x1d9   :  { %v1212_v25 = vpop.f32.mrb[16].mxu1  ;;  %v740_v26 = vmul.f32 %v1565_v57, %v717_v23 }
 0x1da   :  { %v678_v28 = vadd.f32 %v1212_v25, %v1558_v52  ;;  %v672_v29 = vpop.f32.mrb[17].mxu1  ;;  %v772_v36 = vsel %vm750_vm6, %v741_v30, 0.0 }
 0x1db   :  { %767 = vadd.xlane.f32.xlu1 %v766_v27  ;;  %v769_v31 = vsel %vm750_vm6, %v740_v26, 0.0  ;;  %v673_v32 = vadd.f32 %v1558_v52, %v672_v29 }
 0x1dc   :  { %v720_v33 = vmax.f32 %v678_v28, 0.0  ;;  %770 = vadd.xlane.f32.xlu0 %v769_v31 }
 0x1dd   :  { %v719_v34 = vmax.f32 %v673_v32, 0.0  ;;  %v1215_v35 = vpop.f32.mrb[18].mxu1 }
 0x1de   :  { %v688_v37 = vadd.f32 %v1215_v35, %v1558_v52  ;;  %v682_v38 = vpop.f32.mrb[19].mxu1  ;;  %v743_v39 = vmul.f32 %v1565_v57, %v720_v33 }
 0x1df   :  { %773 = vadd.xlane.f32.xlu1 %v772_v36  ;;  %v683_v41 = vadd.f32 %v1558_v52, %v682_v38  ;;  %v742_v42 = vmul.f32 %v1565_v57, %v719_v34 }
 0x1e0   :  { %v722_v43 = vmax.f32 %v688_v37, 0.0  ;;  %v778_v44 = vsel %vm750_vm6, %v743_v39, 0.0 }
 0x1e1   :  { %v721_v45 = vmax.f32 %v683_v41, 0.0  ;;  %v1218_v46 = vpop.f32.mrb[20].mxu1  ;;  %v775_v47 = vsel %vm750_vm6, %v742_v42, 0.0  ;;  %v1613_v42 = vand.u32 127, %v886_v40 }
 0x1e2   :  { %v698_v48 = vadd.f32 %v1218_v46, %v1558_v52  ;;  %v692_v49 = vpop.f32.mrb[21].mxu1  ;;  %v745_v50 = vmul.f32 %v1565_v57, %v722_v43  ;;  %776 = vadd.xlane.f32.xlu0 %v775_v47 }
 0x1e3   :  { %779 = vadd.xlane.f32.xlu1 %v778_v44  ;;  %v693_v51 = vadd.f32 %v1558_v52, %v692_v49  ;;  %v744_v53 = vmul.f32 %v1565_v57, %v721_v45  ;;  %v899_v44 = vadd.s32 4294967280, %v1613_v42  ;;  %v1616_v45 = vshrl.u32 %v886_v40, 7 }
 0x1e4   :  { %v724_v54 = vmax.f32 %v698_v48, 0.0  ;;  %v784_v55 = vsel %vm750_vm6, %v745_v50, 0.0  ;;  %v892_v46 = vadd.s32 4294967288, %v1613_v42 }
 0x1e5   :  { %v723_v56 = vmax.f32 %v693_v51, 0.0  ;;  %v1221_v58 = vpop.f32.mrb[22].mxu1  ;;  %v781_v59 = vsel %vm750_vm6, %v744_v53, 0.0  ;;  %v890_v48 = vsub.s32 %v1613_v42, %v1616_v45  ;;  %v902_v50 = vsub.s32 %v899_v44, %v1616_v45 }
 0x1e6   :  { %v708_v60 = vadd.f32 %v1221_v58, %v1558_v52  ;;  %v747_v61 = vmul.f32 %v1565_v57, %v724_v54  ;;  %v702_v62 = vpop.f32.mrb[23].mxu1  ;;  %782 = vadd.xlane.f32.xlu0 %v781_v59  ;;  %v913_v51 = vadd.s32 4294967264, %v1613_v42  ;;  %v895_v53 = vsub.s32 %v892_v46, %v1616_v45 }
 0x1e7   :  { %785 = vadd.xlane.f32.xlu1 %v784_v55  ;;  %v703_v63 = vadd.f32 %v1558_v52, %v702_v62  ;;  %v746_v0 = vmul.f32 %v1565_v57, %v723_v56  ;;  %v1065_v52 = vld [vmem:[#allocation2] ss:$0 sm:$0xff]  ;;  %v906_v54 = vadd.s32 4294967272, %v1613_v42  ;;  %v920_v62 = vadd.s32 4294967256, %v1613_v42 }
 0x1e8   :  { %v726_v1 = vmax.f32 %v708_v60, 0.0  ;;  %v790_v2 = vsel %vm750_vm6, %v747_v61, 0.0  ;;  %v916_v59 = vsub.s32 %v913_v51, %v1616_v45 }
 0x1e9   :  { %v725_v3 = vmax.f32 %v703_v63, 0.0  ;;  %v787_v4 = vsel %vm750_vm6, %v746_v0, 0.0  ;;  %v909_v61 = vsub.s32 %v906_v54, %v1616_v45  ;;  %v927_v0 = vadd.s32 4294967248, %v1613_v42 }
 0x1ea   :  { %v749_v5 = vmul.f32 %v1565_v57, %v726_v1  ;;  %788 = vadd.xlane.f32.xlu0 %v787_v4 }
 0x1eb   :  { %791 = vadd.xlane.f32.xlu1 %v790_v2  ;;  %v748_v6 = vmul.f32 %v1565_v57, %v725_v3 }
 0x1ec   :  { %v796_v7 = vsel %vm750_vm6, %v749_v5, 0.0  ;;  %v923_v5 = vsub.s32 %v920_v62, %v1616_v45 }
 0x1ed   :  { %v793_v8 = vsel %vm750_vm6, %v748_v6, 0.0  ;;  %v934_v6 = vadd.s32 4294967240, %v1613_v42 }
 0x1ee   :  { %794 = vadd.xlane.f32.xlu0 %v793_v8 }
 0x1ef   :  { %797 = vadd.xlane.f32.xlu1 %v796_v7 }
 0x25c   :  { %v756_v9 = vpop.xlane.xlu0 %755 }
 0x25d   :  { %v807_v10 = vadd.f32 %v1065_v52, %v756_v9  ;;  %v941_v9 = vadd.s32 4294967232, %v1613_v42 }
 0x25f   :  { %842 = vperm.xlu1 %1269, %v807_v10  }
 0x260   :  { %v753_v11 = vpop.xlane.xlu0 %752  ;;  %v762_v12 = vpop.xlane.xlu1 %761 }
 0x261   :  { %v806_v13 = vadd.f32 %v1065_v52, %v753_v11  ;;  %v809_v14 = vadd.f32 %v1065_v52, %v762_v12 }
 0x263   :  { %848 = vperm.xlu1 %1269, %v809_v14   ;;  %839 = vperm.xlu0 %1270, %v806_v13   ;;  %v937_v13 = vsub.s32 %v934_v6, %v1616_v45  ;;  %v948_v14 = vadd.s32 4294967224, %v1613_v42 }
 0x264   :  { %v759_v15 = vpop.xlane.xlu1 %758 }
 0x265   :  { %v808_v16 = vadd.f32 %v1065_v52, %v759_v15  ;;  %v765_v17 = vpop.xlane.xlu0 %764 }
 0x266   :  { %v810_v21 = vadd.f32 %v1065_v52, %v765_v17  ;;  %v944_v17 = vsub.s32 %v941_v9, %v1616_v45 }
 0x267   :  { %845 = vperm.xlu1 %1269, %v808_v16  }
 0x268   :  { %v768_v57 = vpop.xlane.xlu1 %767 }
 0x269   :  { %v811_v18 = vadd.f32 %v1065_v52, %v768_v57  ;;  %v771_v19 = vpop.xlane.xlu0 %770  ;;  %v955_v57 = vadd.s32 4294967216, %v1613_v42 }
 0x26a   :  { %v812_v27 = vadd.f32 %v1065_v52, %v771_v19 }
 0x26b   :  { %854 = vperm.xlu1 %1269, %v811_v18  }
 0x26c   :  { %v774_v20 = vpop.xlane.xlu1 %773 }
 0x26d   :  { %v813_v24 = vadd.f32 %v1065_v52, %v774_v20 }
 0x26f   :  { %851 = vperm.xlu1 %1269, %v810_v21   ;;  %v777_v23 = vpop.xlane.xlu0 %776 }
 0x270   :  { %v780_v22 = vpop.xlane.xlu1 %779  ;;  %v814_v31 = vadd.f32 %v1065_v52, %v777_v23  ;;  %v962_v23 = vadd.s32 4294967208, %v1613_v42 }
 0x271   :  { %v815_v25 = vadd.f32 %v1065_v52, %v780_v22  ;;  %v951_v22 = vsub.s32 %v948_v14, %v1616_v45 }
 0x273   :  { %860 = vperm.xlu1 %1269, %v813_v24   ;;  %866 = vperm.xlu0 %1270, %v815_v25   ;;  %v783_v29 = vpop.xlane.xlu0 %782 }
 0x274   :  { %v786_v26 = vpop.xlane.xlu1 %785  ;;  %v816_v35 = vadd.f32 %v1065_v52, %v783_v29 }
 0x275   :  { %v817_v28 = vadd.f32 %v1065_v52, %v786_v26  ;;  %v958_v26 = vsub.s32 %v955_v57, %v1616_v45 }
 0x277   :  { %857 = vperm.xlu1 %1269, %v812_v27   ;;  %872 = vperm.xlu0 %1270, %v817_v28   ;;  %v789_v34 = vpop.xlane.xlu0 %788  ;;  %v969_v27 = vadd.s32 4294967200, %v1613_v42 }
 0x278   :  { %v792_v30 = vpop.xlane.xlu1 %791  ;;  %v818_v37 = vadd.f32 %v1065_v52, %v789_v34 }
 0x279   :  { %v819_v32 = vadd.f32 %v1065_v52, %v792_v30 }
 0x27b   :  { %878 = vperm.xlu0 %1270, %v819_v32   ;;  %863 = vperm.xlu1 %1269, %v814_v31   ;;  %v795_v38 = vpop.xlane.xlu0 %794  ;;  %v965_v31 = vsub.s32 %v962_v23, %v1616_v45  ;;  %v976_v32 = vadd.s32 4294967192, %v1613_v42 }
 0x27c   :  { %v798_v33 = vpop.xlane.xlu1 %797  ;;  %v820_v39 = vadd.f32 %v1065_v52, %v795_v38 }
 0x27d   :  { %v821_v36 = vadd.f32 %v1065_v52, %v798_v33  ;;  %v930_v52 = vsub.s32 %v927_v0, %v1616_v45 }
 0x27f   :  { %884 = vperm.xlu0 %1270, %v821_v36   ;;  %869 = vperm.xlu1 %1269, %v816_v35   ;;  %v972_v36 = vsub.s32 %v969_v27, %v1616_v45 }
 0x283   :  { %875 = vperm.xlu1 %1269, %v818_v37   ;;  %v983_v37 = vadd.s32 4294967184, %v1613_v42 }
 0x287   :  { %881 = vperm.xlu1 %1269, %v820_v39   ;;  %v990_v39 = vadd.s32 4294967176, %v1613_v42 }
 0x2de   :  { %v843_v41 = vpop.permute.xlu1 %842 }
 0x2df   :  { %v896_v60 = vrot.slane %v843_v41, %v895_v53 }
 0x2e2   :  { %v849_v43 = vpop.permute.xlu1 %848  ;;  %v840_v49 = vpop.permute.xlu0 %839 }
 0x2e3   :  { %v891_v56 = vrot.slane %v840_v49, %v890_v48  ;;  %v910_v4 = vrot.slane %v849_v43, %v909_v61  ;;  %v979_v43 = vsub.s32 %v976_v32, %v1616_v45  ;;  %v993_v48 = vsub.s32 %v990_v39, %v1616_v45 }
 0x2e5   :  { %v898_v1 = vsel %vm897_vm7, %v896_v60, %v891_v56 }
 0x2e6   :  { %v846_v47 = vpop.permute.xlu1 %845 }
 0x2e7   :  { %v903_v58 = vrot.slane %v846_v47, %v902_v50  ;;  %v986_v47 = vsub.s32 %v983_v37, %v1616_v45 }
 0x2e9   :  { %v905_v2 = vsel %vm904_vm8, %v903_v58, %v898_v1 }
 0x2ea   :  { %v855_v55 = vpop.permute.xlu1 %854  ;;  %v912_v10 = vsel %vm911_vm9, %v910_v4, %v905_v2 }
 0x2eb   :  { %v924_v12 = vrot.slane %v855_v55, %v923_v5 }
 0x2ee   :  { %v852_v63 = vpop.permute.xlu1 %851 }
 0x2ef   :  { %v917_v3 = vrot.slane %v852_v63, %v916_v59 }
 0x2f1   :  { %v919_v11 = vsel %vm918_vm10, %v917_v3, %v912_v10 }
 0x2f2   :  { %v861_v7 = vpop.permute.xlu1 %860  ;;  %v867_v8 = vpop.permute.xlu0 %866  ;;  %v926_v18 = vsel %vm925_vm11, %v924_v12, %v919_v11 }
 0x2f3   :  { %v938_v21 = vrot.slane %v861_v7, %v937_v13  ;;  %v952_v30 = vrot.slane %v867_v8, %v951_v22 }
 0x2f6   :  { %v858_v15 = vpop.permute.xlu1 %857  ;;  %v873_v20 = vpop.permute.xlu0 %872 }
 0x2f7   :  { %v931_v16 = vrot.slane %v858_v15, %v930_v52  ;;  %v966_v41 = vrot.slane %v873_v20, %v965_v31 }
 0x2f9   :  { %v933_v19 = vsel %vm932_vm12, %v931_v16, %v926_v18 }
 0x2fa   :  { %v864_v24 = vpop.permute.xlu1 %863  ;;  %v940_v28 = vsel %vm939_vm13, %v938_v21, %v933_v19  ;;  %v879_v34 = vpop.permute.xlu0 %878 }
 0x2fb   :  { %v945_v25 = vrot.slane %v864_v24, %v944_v17  ;;  %v980_v53 = vrot.slane %v879_v34, %v979_v43 }
 0x2fd   :  { %v947_v29 = vsel %vm946_vm14, %v945_v25, %v940_v28 }
 0x2fe   :  { %v870_v33 = vpop.permute.xlu1 %869  ;;  %v954_v38 = vsel %vm953_vm15, %v952_v30, %v947_v29  ;;  %v885_v50 = vpop.permute.xlu0 %884 }
 0x2ff   :  { %v959_v35 = vrot.slane %v870_v33, %v958_v26  ;;  %v994_v55 = vrot.slane %v885_v50, %v993_v48 }
 0x301   :  { %v961_v40 = vsel %vm960_vm0, %v959_v35, %v954_v38 }
 0x302   :  { %v876_v44 = vpop.permute.xlu1 %875  ;;  %v968_v49 = vsel %vm967_vm1, %v966_v41, %v961_v40 }
 0x303   :  { %v973_v46 = vrot.slane %v876_v44, %v972_v36 }
 0x305   :  { %v975_v51 = vsel %vm974_vm2, %v973_v46, %v968_v49 }
 0x306   :  { %v882_v54 = vpop.permute.xlu1 %881  ;;  %v982_v56 = vsel %vm981_vm3, %v980_v53, %v975_v51 }
 0x307   :  { %v987_v42 = vrot.slane %v882_v54, %v986_v47 }
 0x309   :  { %v989_v58 = vsel %vm988_vm4, %v987_v42, %v982_v56 }
 0x30a   :  { %v996_v59 = vsel %vm995_vm5, %v994_v55, %v989_v58 }
 0x30b   :  { %998 = vst [vmem:[#allocation3] sm:$0x1] %v996_v59 }
 0x30c   :  { %1282 = shalt.err (!%p1279_p4)
}
 0x30d   :  { %s1283_s29 = scalar_lea.hbm %s1670_s9, 16 }
 0x30e   :  { %p1284_p5 = scmp.ne.s32.totalorder %s1670_s9, %s1283_s29  ;;  %p1287_p6 = scmp.lt.u32.totalorder %s1283_s29, %s1670_s9 }
 0x310   :  { %p1289_p7 = pnand %p1287_p6, %p1284_p5 }
 0x312   :  { %1292 = shalt.err (!%p1289_p7)
}
 0x313   :  { %1008 = dma.vmem_to_hbm [thread:$0]  %s1006_s7, 16, %s1670_s9, [#allocation4]  }
 0x314   :  { %1293 = dma.done.wait [#allocation4], 16  }
 0x315   :  { %1294 = vsyncadd [#allocation4], 4294967280 }
 0x316   :  { %1012 = vsyncpa [#allocation4], 1 }

</bundles_post_ra>
